<compile_context>
chip_gen: v5e
topology: v5e:2x2
jax: 0.10.0
libtpu: 0.0.40
codegen_flags: <defaults>
</compile_context>

<pallas_src>
import functools

import jax
import jax.numpy as jnp
from jax.experimental import pallas as pl
from jax.experimental.pallas import tpu as pltpu


def gcn_kernel(idx_ref, emb_ref, adj_ref, w1_ref, b1_ref, w2_ref, b2_ref,
               x2_ref, *, vocab):
    """Embedding gather + 2x (GraphConvolution -> ReLU), all lane-padded."""
    n_pad, _ = idx_ref.shape

    # Embedding lookup as a one-hot matmul (exact: selects bf16 rows of emb).
    idx = idx_ref[...]                                               # (Np, 1) i32
    iota = jax.lax.broadcasted_iota(jnp.int32, (n_pad, vocab), 1)    # (Np, V)
    onehot = jnp.where(iota == idx, 1.0, 0.0).astype(jnp.bfloat16)
    feats = jnp.dot(onehot, emb_ref[...],
                    preferred_element_type=jnp.float32)              # (Np, C) f32

    adj = adj_ref[...]                                               # (Np, Np) bf16

    # gc1: relu(adj @ (features @ W1) + b1)
    s1 = jnp.dot(feats.astype(jnp.bfloat16), w1_ref[...],
                 preferred_element_type=jnp.float32)                 # (Np, H)
    x1 = jnp.dot(adj, s1.astype(jnp.bfloat16),
                 preferred_element_type=jnp.float32) + b1_ref[...]
    x1 = jnp.maximum(x1, 0.0)

    # TODO(synk): nn.Dropout(0.5) is treated as inference-mode identity; a
    # training-mode kernel would use pltpu.prng_seed + pltpu.stateful_bernoulli.

    # gc2: relu(adj @ (x1 @ W2) + b2)
    s2 = jnp.dot(x1.astype(jnp.bfloat16), w2_ref[...],
                 preferred_element_type=jnp.float32)                 # (Np, Op)
    x2 = jnp.dot(adj, s2.astype(jnp.bfloat16),
                 preferred_element_type=jnp.float32) + b2_ref[...]
    x2 = jnp.maximum(x2, 0.0)

    x2_ref[...] = x2.astype(x2_ref.dtype)                            # (Np, Op) bf16


def final_linear_kernel(flat_ref, wl_ref, bl_ref, out_ref):
    """out (1, Dop) stays VMEM-resident across the K grid axis (accumulator)."""
    @pl.when(pl.program_id(0) == 0)
    def _():
        out_ref[...] = bl_ref[...]
    out_ref[...] += jnp.dot(flat_ref[...], wl_ref[...],
                            preferred_element_type=jnp.float32)


def gcn_encoder_forward(concept, adj, emb, w1, b1, w2, b2, wl, bl):
    """Pallas GCN_Encoder forward.

    concept: (N,) int          adj: (N, N) f32       emb: (V, C) f32
    w1: (C, H) f32  b1: (H,)   w2: (H, O) f32  b2: (O,)
    wl: (Dl, N*O) f32 (torch nn.Linear weight, out x in)   bl: (Dl,)
    Returns (1, Dl) f32.
    """
    N = concept.shape[0]
    V, C = emb.shape
    H = w1.shape[1]
    O = w2.shape[1]
    Dl = wl.shape[0]
    assert wl.shape[1] == N * O

    def rup(x, m):
        return (x + m - 1) // m * m

    Np = rup(N, 128)
    Op = rup(O, 128)
    Vp = rup(V, 128)
    Dop = rup(Dl, 128)

    # ---- wrapper-side padding / layout plumbing (lane-dense everywhere) ----
    idx_p = jnp.zeros((Np, 1), jnp.int32).at[:N, 0].set(concept.astype(jnp.int32))
    emb_p = jnp.zeros((Vp, C), jnp.bfloat16).at[:V].set(emb.astype(jnp.bfloat16))
    adj_p = jnp.zeros((Np, Np), jnp.bfloat16).at[:N, :N].set(adj.astype(jnp.bfloat16))
    w1_b = w1.astype(jnp.bfloat16)                                   # (C, H)
    b1_p = b1.reshape(1, H).astype(jnp.float32)
    w2_p = jnp.zeros((H, Op), jnp.bfloat16).at[:, :O].set(w2.astype(jnp.bfloat16))
    b2_p = jnp.zeros((1, Op), jnp.float32).at[0, :O].set(b2.astype(jnp.float32))

    # Final Linear: transpose to (in, out), reshape to (N, O, Dl) and zero-pad to
    # (Np, Op, Dop) so its row order matches the padded flatten of x2; padded
    # rows are zero, so padded x2 entries cannot contaminate the result.
    wl3 = wl.T.reshape(N, O, Dl)
    wl_pad = jnp.zeros((Np, Op, Dop), jnp.bfloat16)
    wl_pad = wl_pad.at[:N, :O, :Dl].set(wl3.astype(jnp.bfloat16))
    wl_pad = wl_pad.reshape(Np * Op, Dop)                            # (K, Dop)
    bl_pad = jnp.zeros((1, Dop), jnp.float32).at[0, :Dl].set(bl.astype(jnp.float32))

    # ---- kernel 1: embedding + both GraphConvolutions + ReLUs ----
    def full_spec(shape):
        nd = len(shape)
        return pl.BlockSpec(shape, lambda i, _n=nd: (0,) * _n)

    x2_p = pl.pallas_call(
        functools.partial(gcn_kernel, vocab=Vp),
        out_shape=jax.ShapeDtypeStruct((Np, Op), jnp.bfloat16),
        grid=(1,),
        in_specs=[
            full_spec((Np, 1)),
            full_spec((Vp, C)),
            full_spec((Np, Np)),
            full_spec((C, H)),
            full_spec((1, H)),
            full_spec((H, Op)),
            full_spec((1, Op)),
        ],
        out_specs=full_spec((Np, Op)),
        compiler_params=pltpu.CompilerParams(
            dimension_semantics=("arbitrary",)),
    )(idx_p, emb_p, adj_p, w1_b, b1_p, w2_p, b2_p)

    # torch's x.view(1, -1): free row-major reshape in HBM, outside the kernel.
    flat = x2_p.reshape(1, Np * Op)                                  # (1, K) bf16

    # ---- kernel 2: flat @ W_l^T + b_l, weight streamed over K ----
    K = Np * Op
    KT = 2048
    n_k = K // KT

    out_pad = pl.pallas_call(
        final_linear_kernel,
        out_shape=jax.ShapeDtypeStruct((1, Dop), jnp.float32),
        grid=(n_k,),
        in_specs=[
            pl.BlockSpec((1, KT), lambda k: (0, k)),
            pl.BlockSpec((KT, Dop), lambda k: (k, 0)),
            pl.BlockSpec((1, Dop), lambda k: (0, 0)),
        ],
        out_specs=pl.BlockSpec((1, Dop), lambda k: (0, 0)),
        compiler_params=pltpu.CompilerParams(
            dimension_semantics=("arbitrary",)),
    )(flat, wl_pad, bl_pad)

    return out_pad[:, :Dl]


if __name__ == "__main__":
    # Shapes consistent with the module: the final nn.Linear expects
    # hid_dim = 100 * 100, so num_concepts N = 100 and output_dim = 100.
    N, V, C, H, O, DL = 100, 200, 64, 64, 100, 300

    key = jax.random.PRNGKey(0)
    ks = jax.random.split(key, 9)

    concept = jax.random.randint(ks[0], (N,), 0, V, jnp.int32)
    # Sparse adjacency with self loops, row-normalized.
    a = (jax.random.uniform(ks[1], (N, N)) < 0.1).astype(jnp.float32) + jnp.eye(N)
    adj = a / jnp.sum(a, axis=1, keepdims=True)

    emb = jax.random.normal(ks[2], (V, C), jnp.float32)

    # GraphConvolution init: uniform(+-1/sqrt(out_features)) for weight and bias.
    sd1 = 1.0 / (H ** 0.5)
    w1 = jax.random.uniform(ks[3], (C, H), jnp.float32, -sd1, sd1)
    b1 = jax.random.uniform(ks[4], (H,), jnp.float32, -sd1, sd1)
    sd2 = 1.0 / (O ** 0.5)
    w2 = jax.random.uniform(ks[5], (H, O), jnp.float32, -sd2, sd2)
    b2 = jax.random.uniform(ks[6], (O,), jnp.float32, -sd2, sd2)

    # nn.Linear(100*100, 300) default init: uniform(+-1/sqrt(fan_in)).
    sdl = 1.0 / ((N * O) ** 0.5)
    wl = jax.random.uniform(ks[7], (DL, N * O), jnp.float32, -sdl, sdl)
    bl = jax.random.uniform(ks[8], (DL,), jnp.float32, -sdl, sdl)

    out = gcn_encoder_forward(concept, adj, emb, w1, b1, w2, b2, wl, bl)
    out = jax.block_until_ready(out)
    assert out.shape == (1, DL)

    # Plain-JAX reference of the same math (same bf16 operand rounding).
    f32, bf16 = jnp.float32, jnp.bfloat16
    hp = jax.lax.Precision.HIGHEST
    emb_b = emb.astype(bf16).astype(f32)
    adj_b = adj.astype(bf16).astype(f32)
    w1_r = w1.astype(bf16).astype(f32)
    w2_r = w2.astype(bf16).astype(f32)
    wl_r = wl.astype(bf16).astype(f32)

    feats = emb_b[concept]
    t1 = jnp.dot(feats.astype(bf16).astype(f32), w1_r, precision=hp)
    x1 = jnp.maximum(jnp.dot(adj_b, t1.astype(bf16).astype(f32), precision=hp) + b1, 0.0)
    t2 = jnp.dot(x1.astype(bf16).astype(f32), w2_r, precision=hp)
    x2 = jnp.maximum(jnp.dot(adj_b, t2.astype(bf16).astype(f32), precision=hp) + b2, 0.0)
    flat_ref = x2.astype(bf16).astype(f32).reshape(1, -1)
    ref = jnp.dot(flat_ref, wl_r.T, precision=hp) + bl

    assert jnp.allclose(out, ref, atol=2e-2, rtol=2e-2), \
        float(jnp.max(jnp.abs(out - ref)))
    print("KERNEL_OK")
</pallas_src>

<mosaic_0001>
module attributes {stable_mosaic.version = 11 : i64} {
  func.func @gcn_kernel(%arg0: i32, %arg1: memref<128x1xi32, #tpu.memory_space<vmem>>, %arg2: memref<256x64xbf16, #tpu.memory_space<vmem>>, %arg3: memref<128x128xbf16, #tpu.memory_space<vmem>>, %arg4: memref<64x64xbf16, #tpu.memory_space<vmem>>, %arg5: memref<1x64xf32, #tpu.memory_space<vmem>>, %arg6: memref<64x128xbf16, #tpu.memory_space<vmem>>, %arg7: memref<1x128xf32, #tpu.memory_space<vmem>>, %arg8: memref<128x128xbf16, #tpu.memory_space<vmem>>) attributes {dimension_semantics = [#tpu.dimension_semantics<arbitrary>], iteration_bounds = array<i64: 1>, scalar_prefetch = 0 : i64, scratch_operands = 0 : i64, tpu.core_type = #tpu.core_type<tc>, window_params = [{pipeline_mode = #tpu.pipeline_mode<synchronous>, transform_indices = @transform_0, window_bounds = array<i64: 128, 1>}, {pipeline_mode = #tpu.pipeline_mode<synchronous>, transform_indices = @transform_1, window_bounds = array<i64: 256, 64>}, {pipeline_mode = #tpu.pipeline_mode<synchronous>, transform_indices = @transform_2, window_bounds = array<i64: 128, 128>}, {pipeline_mode = #tpu.pipeline_mode<synchronous>, transform_indices = @transform_3, window_bounds = array<i64: 64, 64>}, {pipeline_mode = #tpu.pipeline_mode<synchronous>, transform_indices = @transform_4, window_bounds = array<i64: 1, 64>}, {pipeline_mode = #tpu.pipeline_mode<synchronous>, transform_indices = @transform_5, window_bounds = array<i64: 64, 128>}, {pipeline_mode = #tpu.pipeline_mode<synchronous>, transform_indices = @transform_6, window_bounds = array<i64: 1, 128>}, {pipeline_mode = #tpu.pipeline_mode<synchronous>, transform_indices = @transform_7, window_bounds = array<i64: 128, 128>}]} {
    %c0 = arith.constant 0 : index
    %c0_0 = arith.constant 0 : index
    %0 = vector.load %arg1[%c0, %c0_0] : memref<128x1xi32, #tpu.memory_space<vmem>>, vector<128x1xi32>
    %1 = tpu.iota {dimensions = array<i32: 1>} : vector<128x256xi32>
    %2 = vector.broadcast %0 : vector<128x1xi32> to vector<128x256xi32>
    %3 = arith.cmpi eq, %1, %2 : vector<128x256xi32>
    %cst = arith.constant 1.000000e+00 : f32
    %cst_1 = arith.constant 0.000000e+00 : f32
    %4 = vector.broadcast %cst : f32 to vector<128x256xf32>
    %5 = vector.broadcast %cst_1 : f32 to vector<128x256xf32>
    %6 = arith.select %3, %4, %5 : vector<128x256xi1>, vector<128x256xf32>
    %7 = arith.truncf %6 : vector<128x256xf32> to vector<128x256xbf16>
    %c0_2 = arith.constant 0 : index
    %c0_3 = arith.constant 0 : index
    %8 = vector.load %arg2[%c0_2, %c0_3] : memref<256x64xbf16, #tpu.memory_space<vmem>>, vector<256x64xbf16>
    %cst_4 = arith.constant dense<0.000000e+00> : vector<128x64xf32>
    %9 = tpu.matmul %7, %8, %cst_4 {dimension_numbers = #tpu.dot_dimension_numbers<[1], [0], [0], [1], [0, 0, 1, 1], [], []>} : vector<128x256xbf16>, vector<256x64xbf16>, vector<128x64xf32> -> vector<128x64xf32>
    %c0_5 = arith.constant 0 : index
    %c0_6 = arith.constant 0 : index
    %10 = vector.load %arg3[%c0_5, %c0_6] : memref<128x128xbf16, #tpu.memory_space<vmem>>, vector<128x128xbf16>
    %11 = arith.truncf %9 : vector<128x64xf32> to vector<128x64xbf16>
    %c0_7 = arith.constant 0 : index
    %c0_8 = arith.constant 0 : index
    %12 = vector.load %arg4[%c0_7, %c0_8] : memref<64x64xbf16, #tpu.memory_space<vmem>>, vector<64x64xbf16>
    %cst_9 = arith.constant dense<0.000000e+00> : vector<128x64xf32>
    %13 = tpu.matmul %11, %12, %cst_9 {dimension_numbers = #tpu.dot_dimension_numbers<[1], [0], [0], [1], [0, 0, 1, 1], [], []>} : vector<128x64xbf16>, vector<64x64xbf16>, vector<128x64xf32> -> vector<128x64xf32>
    %14 = arith.truncf %13 : vector<128x64xf32> to vector<128x64xbf16>
    %cst_10 = arith.constant dense<0.000000e+00> : vector<128x64xf32>
    %15 = tpu.matmul %10, %14, %cst_10 {dimension_numbers = #tpu.dot_dimension_numbers<[1], [0], [0], [1], [0, 0, 1, 1], [], []>} : vector<128x128xbf16>, vector<128x64xbf16>, vector<128x64xf32> -> vector<128x64xf32>
    %c0_11 = arith.constant 0 : index
    %c0_12 = arith.constant 0 : index
    %16 = vector.load %arg5[%c0_11, %c0_12] : memref<1x64xf32, #tpu.memory_space<vmem>>, vector<1x64xf32>
    %17 = vector.broadcast %16 : vector<1x64xf32> to vector<128x64xf32>
    %18 = arith.addf %15, %17 : vector<128x64xf32>
    %cst_13 = arith.constant 0.000000e+00 : f32
    %19 = vector.broadcast %cst_13 : f32 to vector<128x64xf32>
    %20 = arith.maximumf %18, %19 : vector<128x64xf32>
    %21 = arith.truncf %20 : vector<128x64xf32> to vector<128x64xbf16>
    %c0_14 = arith.constant 0 : index
    %c0_15 = arith.constant 0 : index
    %22 = vector.load %arg6[%c0_14, %c0_15] : memref<64x128xbf16, #tpu.memory_space<vmem>>, vector<64x128xbf16>
    %cst_16 = arith.constant dense<0.000000e+00> : vector<128x128xf32>
    %23 = tpu.matmul %21, %22, %cst_16 {dimension_numbers = #tpu.dot_dimension_numbers<[1], [0], [0], [1], [0, 0, 1, 1], [], []>} : vector<128x64xbf16>, vector<64x128xbf16>, vector<128x128xf32> -> vector<128x128xf32>
    %24 = arith.truncf %23 : vector<128x128xf32> to vector<128x128xbf16>
    %cst_17 = arith.constant dense<0.000000e+00> : vector<128x128xf32>
    %25 = tpu.matmul %10, %24, %cst_17 {dimension_numbers = #tpu.dot_dimension_numbers<[1], [0], [0], [1], [0, 0, 1, 1], [], []>} : vector<128x128xbf16>, vector<128x128xbf16>, vector<128x128xf32> -> vector<128x128xf32>
    %c0_18 = arith.constant 0 : index
    %c0_19 = arith.constant 0 : index
    %26 = vector.load %arg7[%c0_18, %c0_19] : memref<1x128xf32, #tpu.memory_space<vmem>>, vector<1x128xf32>
    %27 = vector.broadcast %26 : vector<1x128xf32> to vector<128x128xf32>
    %28 = arith.addf %25, %27 : vector<128x128xf32>
    %cst_20 = arith.constant 0.000000e+00 : f32
    %29 = vector.broadcast %cst_20 : f32 to vector<128x128xf32>
    %30 = arith.maximumf %28, %29 : vector<128x128xf32>
    %31 = arith.truncf %30 : vector<128x128xf32> to vector<128x128xbf16>
    %c0_21 = arith.constant 0 : index
    %c0_22 = arith.constant 0 : index
    %32 = vector.load %arg8[%c0_21, %c0_22] : memref<128x128xbf16, #tpu.memory_space<vmem>>, vector<128x128xbf16>
    tpu.vector_store %arg8[%c0_21, %c0_22], %31 {strides = array<i32>} : memref<128x128xbf16, #tpu.memory_space<vmem>>, vector<128x128xbf16>,
    return
  }
  func.func @transform_0(%arg0: i32) -> (i32, i32) {
    %c0_i32 = arith.constant 0 : i32
    %c0_i32_0 = arith.constant 0 : i32
    %c0_i32_1 = arith.constant 0 : i32
    return %c0_i32, %c0_i32_0 : i32, i32
  }
  func.func @transform_1(%arg0: i32) -> (i32, i32) {
    %c0_i32 = arith.constant 0 : i32
    %c0_i32_0 = arith.constant 0 : i32
    %c0_i32_1 = arith.constant 0 : i32
    return %c0_i32, %c0_i32_0 : i32, i32
  }
  func.func @transform_2(%arg0: i32) -> (i32, i32) {
    %c0_i32 = arith.constant 0 : i32
    %c0_i32_0 = arith.constant 0 : i32
    %c0_i32_1 = arith.constant 0 : i32
    return %c0_i32, %c0_i32_0 : i32, i32
  }
  func.func @transform_3(%arg0: i32) -> (i32, i32) {
    %c0_i32 = arith.constant 0 : i32
    %c0_i32_0 = arith.constant 0 : i32
    %c0_i32_1 = arith.constant 0 : i32
    return %c0_i32, %c0_i32_0 : i32, i32
  }
  func.func @transform_4(%arg0: i32) -> (i32, i32) {
    %c0_i32 = arith.constant 0 : i32
    %c0_i32_0 = arith.constant 0 : i32
    %c0_i32_1 = arith.constant 0 : i32
    return %c0_i32, %c0_i32_0 : i32, i32
  }
  func.func @transform_5(%arg0: i32) -> (i32, i32) {
    %c0_i32 = arith.constant 0 : i32
    %c0_i32_0 = arith.constant 0 : i32
    %c0_i32_1 = arith.constant 0 : i32
    return %c0_i32, %c0_i32_0 : i32, i32
  }
  func.func @transform_6(%arg0: i32) -> (i32, i32) {
    %c0_i32 = arith.constant 0 : i32
    %c0_i32_0 = arith.constant 0 : i32
    %c0_i32_1 = arith.constant 0 : i32
    return %c0_i32, %c0_i32_0 : i32, i32
  }
  func.func @transform_7(%arg0: i32) -> (i32, i32) {
    %c0_i32 = arith.constant 0 : i32
    %c0_i32_0 = arith.constant 0 : i32
    %c0_i32_1 = arith.constant 0 : i32
    return %c0_i32, %c0_i32_0 : i32, i32
  }
}

</mosaic_0001>

<bundles_post_ra>
// kernel: tpu_custom_call.1
= control target key start
LH: loop header
LB: loop body
LE: loop exit
PB: predicated region body
PF: predicated region fallthrough
CT: control target
= control target key end

     0   :  { %v1199_v2 = vmov 0   ;;  %s1524_s0 = inlined_call_operand.vmem [shape: s32[128,1], index: 0, kind: input, shape index: {}]   ;;  %s1525_s1 = inlined_call_operand.vmem [shape: bf16[256,64], index: 1, kind: input, shape index: {}]   ;;  %s1526_s2 = inlined_call_operand.vmem [shape: bf16[128,128], index: 2, kind: input, shape index: {}]   ;;  %s1527_s3 = inlined_call_operand.vmem [shape: bf16[64,64], index: 3, kind: input, shape index: {}]   ;;  %s1528_s4 = inlined_call_operand.vmem [shape: f32[1,64], index: 4, kind: input, shape index: {}]   ;;  %s1529_s5 = inlined_call_operand.vmem [shape: bf16[64,128], index: 5, kind: input, shape index: {}]   ;;  %s1530_s6 = inlined_call_operand.vmem [shape: f32[1,128], index: 6, kind: input, shape index: {}]   ;;  %s1531_s7 = inlined_call_operand.hbm [shape: bf16[128,128], index: 7, kind: output, shape index: {}]  }
   0x1   :  { %v38_v0 = vld [vmem:[%s1524_s0 + $0x50] sm:$0xff]  ;;  %v36_v1 = vld [vmem:[%s1524_s0 + $0x40] sm:$0xff]  ;;  %1169 = vset.pattern.permute.xlu1 %v1199_v2  ;;  %1168 = vset.pattern.permute.xlu0 %v1199_v2 }
   0x2   :  { %78 = vperm.xlu1 %1169, %v38_v0   ;;  %72 = vperm.xlu0 %1168, %v36_v1   ;;  %v40_v3 = vld [vmem:[%s1524_s0 + $0x60] sm:$0xff] }
   0x3   :  { %1170 = vset.pattern.permute.xlu2 %v1199_v2 }
   0x4   :  { %84 = vperm.xlu2 %1170, %v40_v3  }
   0x5   :  { %12 = vsyncpa [#allocation3], 0  ;;  %v39_v4 = vld [vmem:[%s1524_s0 + $0x58] sm:$0xff]  ;;  %v37_v5 = vld [vmem:[%s1524_s0 + $0x48] sm:$0xff]  ;;  %v44_v23 = vlaneseq  ;;  %v1200_v35 = vmov 1.0|1.0  }
   0x6   :  { %v41_v6 = vld [vmem:[%s1524_s0 + $0x68] sm:$0xff]  ;;  %v1079_v7 = vld [vmem:[%s1525_s1 + $0x38] sm:$0xff]  ;;  %v1078_v8 = vld [vmem:[%s1525_s1 + $0x30] sm:$0xff]  ;;  %s1202_s26 = smov 64   ;;  %s1203_s27 = smov 4  }
   0x7   :  { %1151 = vmatpush.bf16.msra.mxu1 %v1079_v7  ;;  %303 = vmatpush.bf16.msra.mxu0 %v1079_v7  ;;  %v43_v9 = vld [vmem:[%s1524_s0 + $0x78] sm:$0xff]  ;;  %v42_v10 = vld [vmem:[%s1524_s0 + $0x70] sm:$0xff]  ;;  %v1077_v11 = vld [vmem:[%s1525_s1 + $0x28] sm:$0xff]  ;;  %v1316_v26 = vand.u32 127, %v44_v23 }
   0x8   :  { %v28_v12 = vld [vmem:[%s1524_s0] sm:$0xff]  ;;  %v30_v14 = vld [vmem:[%s1524_s0 + $0x10] sm:$0xff]  ;;  %v29_v15 = vld [vmem:[%s1524_s0 + $0x8] sm:$0xff] }
   0x9   :  { %v1076_v13 = vld [vmem:[%s1525_s1 + $0x20] sm:$0xff]  ;;  %v1075_v16 = vld [vmem:[%s1525_s1 + $0x18] sm:$0xff]  ;;  %v1074_v18 = vld [vmem:[%s1525_s1 + $0x10] sm:$0xff]  ;;  %v1319_v27 = vadd.s32 128, %v1316_v26 }
   0xa   :  { %81 = vperm.xlu1 %1169, %v39_v4   ;;  %75 = vperm.xlu0 %1168, %v37_v5   ;;  %v31_v17 = vld [vmem:[%s1524_s0 + $0x18] sm:$0xff]  ;;  %v33_v19 = vld [vmem:[%s1524_s0 + $0x28] sm:$0xff]  ;;  %v32_v20 = vld [vmem:[%s1524_s0 + $0x20] sm:$0xff] }
   0xb   :  { %1152 = vmatpush.bf16.msra.mxu1 %v1078_v8  ;;  %304 = vmatpush.bf16.msra.mxu0 %v1078_v8  ;;  %v34_v21 = vld [vmem:[%s1524_s0 + $0x30] sm:$0xff]  ;;  %v35_v22 = vld [vmem:[%s1524_s0 + $0x38] sm:$0xff]  ;;  %v1073_v24 = vld [vmem:[%s1525_s1 + $0x8] sm:$0xff]  ;;  %s884_s0 = sshll.u32 %s1531_s7, 4  ;;  %s885_s0 = int_to_ptr.hbm [resolvable:$true] %s884_s0 }
   0xc   :  { %87 = vperm.xlu2 %1170, %v41_v6   ;;  %v1072_v25 = vld [vmem:[%s1525_s1] sm:$0xff]  ;;  %v1087_v36 = vld [vmem:[%s1525_s1 + $0x78] sm:$0xff]  ;;  %v1086_v38 = vld [vmem:[%s1525_s1 + $0x70] sm:$0xff] }
   0xd   :  { %v1085_v42 = vld [vmem:[%s1525_s1 + $0x68] sm:$0xff]  ;;  %v1084_v44 = vld [vmem:[%s1525_s1 + $0x60] sm:$0xff]  ;;  %v1083_v47 = vld [vmem:[%s1525_s1 + $0x58] sm:$0xff] }
   0xe   :  { %v1082_v48 = vld [vmem:[%s1525_s1 + $0x50] sm:$0xff]  ;;  %v1081_v49 = vld [vmem:[%s1525_s1 + $0x48] sm:$0xff]  ;;  %v1080_v52 = vld [vmem:[%s1525_s1 + $0x40] sm:$0xff] }
   0xf   :  { %1153 = vmatpush.bf16.msra.mxu1 %v1077_v11  ;;  %305 = vmatpush.bf16.msra.mxu0 %v1077_v11  ;;  %v1099_v61 = vld [vmem:[%s1527_s3 + $0x18] sm:$0xff]  ;;  %v1098_v63 = vld [vmem:[%s1527_s3 + $0x10] sm:$0xff]  ;;  %v1097_v0 = vld [vmem:[%s1527_s3 + $0x8] sm:$0xff] }
  0x10   :  { %486 = vmatpush.bf16.msra.mxu2 %v1099_v61  ;;  %1159 = vmatpush.bf16.msra.mxu3 %v1099_v61  ;;  %v1096_v2 = vld [vmem:[%s1527_s3] sm:$0xff] }
  0x12   :  { %93 = vperm.xlu1 %1169, %v43_v9   ;;  %90 = vperm.xlu0 %1168, %v42_v10  }
  0x13   :  { %1154 = vmatpush.bf16.msra.mxu1 %v1076_v13  ;;  %306 = vmatpush.bf16.msra.mxu0 %v1076_v13 }
  0x14   :  { %48 = vperm.xlu2 %1170, %v28_v12   ;;  %487 = vmatpush.bf16.msra.mxu2 %v1098_v63 }
  0x15   :  { %1160 = vmatpush.bf16.msra.mxu3 %v1098_v63 }
  0x17   :  { %1155 = vmatpush.bf16.msra.mxu1 %v1075_v16  ;;  %307 = vmatpush.bf16.msra.mxu0 %v1075_v16 }
  0x18   :  { %488 = vmatpush.bf16.msra.mxu2 %v1097_v0 }
  0x19   :  { %1161 = vmatpush.bf16.msra.mxu3 %v1097_v0 }
  0x1a   :  { %54 = vperm.xlu1 %1169, %v30_v14   ;;  %51 = vperm.xlu0 %1168, %v29_v15  }
  0x1b   :  { %1156 = vmatpush.bf16.msra.mxu1 %v1074_v18  ;;  %308 = vmatpush.bf16.msra.mxu0 %v1074_v18 }
  0x1c   :  { %57 = vperm.xlu2 %1170, %v31_v17   ;;  %489 = vmatpush.bf16.msra.mxu2 %v1096_v2 }
  0x1d   :  { %1162 = vmatpush.bf16.msra.mxu3 %v1096_v2 }
  0x1f   :  { %1157 = vmatpush.bf16.msra.mxu1 %v1073_v24  ;;  %309 = vmatpush.bf16.msra.mxu0 %v1073_v24 }
  0x22   :  { %63 = vperm.xlu1 %1169, %v33_v19   ;;  %60 = vperm.xlu0 %1168, %v32_v20  }
  0x23   :  { %1158 = vmatpush.bf16.msra.mxu1 %v1072_v25  ;;  %310 = vmatpush.bf16.msra.mxu0 %v1072_v25 }
  0x24   :  { %66 = vperm.xlu2 %1170, %v34_v21  }
  0x27   :  { %352 = vmatpush.bf16.msrb.mxu1 %v1087_v36 }
  0x2a   :  { %69 = vperm.xlu0 %1168, %v35_v22  }
  0x2b   :  { %353 = vmatpush.bf16.msrb.mxu1 %v1086_v38 }
  0x2f   :  { %354 = vmatpush.bf16.msrb.mxu1 %v1085_v42 }
  0x33   :  { %355 = vmatpush.bf16.msrb.mxu1 %v1084_v44 }
  0x37   :  { %356 = vmatpush.bf16.msrb.mxu1 %v1083_v47 }
  0x3b   :  { %357 = vmatpush.bf16.msrb.mxu1 %v1082_v48 }
  0x3f   :  { %358 = vmatpush.bf16.msrb.mxu1 %v1081_v49 }
  0x43   :  { %359 = vmatpush.bf16.msrb.mxu1 %v1080_v52 }
  0x5e   :  { %v85_v28 = vpop.permute.xlu2 %84 }
  0x5f   :  { %vm120_vm0 = vcmp.eq.s32.totalorder %v1319_v27, %v85_v28 }
  0x66   :  { %v88_v29 = vpop.permute.xlu2 %87 }
  0x67   :  { %vm122_vm1 = vcmp.eq.s32.totalorder %v1319_v27, %v88_v29 }
  0x68   :  { %vm1325_vm4 = vmpackc.low %vm122_vm1, %vm120_vm0 }
  0x6e   :  { %v49_v45 = vpop.permute.xlu2 %48 }
  0x6f   :  { %vm95_vm1 = vcmp.eq.s32.totalorder %v1316_v26, %v49_v45 }
  0x74   :  { %v79_v30 = vpop.permute.xlu1 %78  ;;  %v73_v31 = vpop.permute.xlu0 %72 }
  0x75   :  { %vm116_vm2 = vcmp.eq.s32.totalorder %v1319_v27, %v79_v30  ;;  %vm112_vm3 = vcmp.eq.s32.totalorder %v1319_v27, %v73_v31  ;;  %vm111_vm5 = vcmp.eq.s32.totalorder %v1316_v26, %v73_v31  ;;  %vm115_vm15 = vcmp.eq.s32.totalorder %v1316_v26, %v79_v30 }
  0x76   :  { %v58_v51 = vpop.permute.xlu2 %57 }
  0x7c   :  { %v82_v33 = vpop.permute.xlu1 %81  ;;  %v76_v34 = vpop.permute.xlu0 %75 }
  0x7d   :  { %vm118_vm6 = vcmp.eq.s32.totalorder %v1319_v27, %v82_v33  ;;  %vm113_vm7 = vcmp.eq.s32.totalorder %v1316_v26, %v76_v34  ;;  %vm114_vm8 = vcmp.eq.s32.totalorder %v1319_v27, %v76_v34  ;;  %vm117_vm0 = vcmp.eq.s32.totalorder %v1316_v26, %v82_v33 }
  0x7e   :  { %vm968_vm9 = vmpackc.low %vm113_vm7, %vm111_vm5  ;;  %vm121_vm7 = vcmp.eq.s32.totalorder %v1316_v26, %v88_v29  ;;  %v67_v56 = vpop.permute.xlu2 %66 }
  0x7f   :  { %969 = vmatmul.msk.bf16.vlgmr.msra.gmra.mxu1 %vm968_vm9, %v1200_v35  ;;  %vm1337_vm10 = vmpackc.low %vm114_vm8, %vm112_vm3  ;;  %vm101_vm9 = vcmp.eq.s32.totalorder %v1316_v26, %v58_v51 }
  0x80   :  { %vm1346_vm11 = vmpackc.low %vm118_vm6, %vm116_vm2  ;;  %vm119_vm6 = vcmp.eq.s32.totalorder %v1316_v26, %v85_v28 }
  0x81   :  { %vm970_vm3 = vmpackc.low %vm117_vm0, %vm115_vm15 }
  0x84   :  { %v94_v40 = vpop.permute.xlu1 %93  ;;  %v91_v41 = vpop.permute.xlu0 %90 }
  0x85   :  { %vm126_vm12 = vcmp.eq.s32.totalorder %v1319_v27, %v94_v40  ;;  %vm124_vm13 = vcmp.eq.s32.totalorder %v1319_v27, %v91_v41  ;;  %vm125_vm15 = vcmp.eq.s32.totalorder %v1316_v26, %v94_v40  ;;  %vm123_vm0 = vcmp.eq.s32.totalorder %v1316_v26, %v91_v41 }
  0x86   :  { %vm1355_vm14 = vmpackc.low %vm126_vm12, %vm124_vm13 }
  0x87   :  { %vm972_vm12 = vmpackc.low %vm121_vm7, %vm119_vm6  ;;  %vm96_vm6 = vcmp.eq.s32.totalorder %v1319_v27, %v49_v45 }
  0x8c   :  { %v52_v46 = vpop.permute.xlu0 %51  ;;  %v55_v50 = vpop.permute.xlu1 %54 }
  0x8d   :  { %vm97_vm2 = vcmp.eq.s32.totalorder %v1316_v26, %v52_v46  ;;  %vm99_vm8 = vcmp.eq.s32.totalorder %v1316_v26, %v55_v50  ;;  %vm98_vm7 = vcmp.eq.s32.totalorder %v1319_v27, %v52_v46 }
  0x8e   :  { %vm960_vm5 = vmpackc.low %vm97_vm2, %vm95_vm1 }
  0x8f   :  { %971 = vmatmul.msk.bf16.gmra.mxu1 %vm970_vm3, %v1200_v35  ;;  %961 = vmatmul.msk.bf16.vlgmr.msra.gmra.mxu0 %vm960_vm5, %v1200_v35  ;;  %vm962_vm13 = vmpackc.low %vm101_vm9, %vm99_vm8 }
  0x90   :  { %vm974_vm3 = vmpackc.low %vm125_vm15, %vm123_vm0  ;;  %vm100_vm15 = vcmp.eq.s32.totalorder %v1319_v27, %v55_v50  ;;  %vm102_vm0 = vcmp.eq.s32.totalorder %v1319_v27, %v58_v51 }
  0x91   :  { %vm976_vm9 = vmpackc.low %vm98_vm7, %vm96_vm6  ;;  %vm108_vm7 = vcmp.eq.s32.totalorder %v1319_v27, %v67_v56 }
  0x94   :  { %v64_v53 = vpop.permute.xlu1 %63  ;;  %v61_v54 = vpop.permute.xlu0 %60 }
  0x95   :  { %vm105_vm1 = vcmp.eq.s32.totalorder %v1316_v26, %v64_v53  ;;  %vm103_vm2 = vcmp.eq.s32.totalorder %v1316_v26, %v61_v54 }
  0x96   :  { %vm964_vm5 = vmpackc.low %vm105_vm1, %vm103_vm2  ;;  %vm106_vm2 = vcmp.eq.s32.totalorder %v1319_v27, %v64_v53 }
  0x97   :  { %vm978_vm1 = vmpackc.low %vm102_vm0, %vm100_vm15 }
  0x9c   :  { %v70_v55 = vpop.permute.xlu0 %69 }
  0x9d   :  { %vm109_vm8 = vcmp.eq.s32.totalorder %v1316_v26, %v70_v55  ;;  %vm110_vm6 = vcmp.eq.s32.totalorder %v1319_v27, %v70_v55 }
  0x9f   :  { %973 = vmatmul.msk.bf16.gmra.mxu1 %vm972_vm12, %v1200_v35  ;;  %963 = vmatmul.msk.bf16.gmra.mxu0 %vm962_vm13, %v1200_v35  ;;  %vm107_vm12 = vcmp.eq.s32.totalorder %v1316_v26, %v67_v56 }
  0xa0   :  { %vm966_vm13 = vmpackc.low %vm109_vm8, %vm107_vm12 }
  0xa1   :  { %vm982_vm8 = vmpackc.low %vm110_vm6, %vm108_vm7 }
  0xaf   :  { %975 = vmatmul.msk.bf16.gmra.mxu1 %vm974_vm3, %v1200_v35  ;;  %965 = vmatmul.msk.bf16.gmra.mxu0 %vm964_vm5, %v1200_v35  ;;  %vm104_vm3 = vcmp.eq.s32.totalorder %v1319_v27, %v61_v54 }
  0xb0   :  { %vm980_vm5 = vmpackc.low %vm106_vm2, %vm104_vm3 }
  0xbf   :  { %977 = vmatmul.msk.bf16.vlgmr.msrb.gmra.mxu1 %vm976_vm9, %v1200_v35  ;;  %967 = vmatmul.msk.bf16.gmra.mxu0 %vm966_vm13, %v1200_v35 }
  0xcf   :  { %979 = vmatmul.msk.bf16.gmra.mxu1 %vm978_vm1, %v1200_v35 }
  0xdf   :  { %981 = vmatmul.msk.bf16.gmra.mxu1 %vm980_vm5, %v1200_v35 }
  0xef   :  { %983 = vmatmul.msk.bf16.gmra.mxu1 %vm982_vm8, %v1200_v35 }
  0xfc   :  { %v332_v57 = vpop.f32.mrf.mxu1 }
  0xff   :  { %985 = vmatmul.msk.bf16.gmra.mxu1 %vm1337_vm10, %v1200_v35 }
 0x104   :  { %v334_v58 = vpop.f32.mrf.mxu1 }
 0x10c   :  { %v337_v59 = vpop.f32.mrf.mxu1  ;;  %v312_v4 = vpop.f32.mrf.mxu0 }
 0x10f   :  { %987 = vmatmul.msk.bf16.gmra.mxu1 %vm1346_vm11, %v1200_v35 }
 0x114   :  { %v339_v60 = vpop.f32.mrf.mxu1  ;;  %v314_v6 = vpop.f32.mrf.mxu0 }
 0x11c   :  { %v342_v62 = vpop.f32.mrf.mxu1  ;;  %v317_v8 = vpop.f32.mrf.mxu0 }
 0x11f   :  { %989 = vmatmul.msk.bf16.gmra.mxu1 %vm1325_vm4, %v1200_v35  ;;  %vm457_vm4 = vcmask 523264  }
 0x124   :  { %v344_v1 = vpop.f32.mrf.mxu1  ;;  %v319_v13 = vpop.f32.mrf.mxu0 }
 0x12c   :  { %v347_v3 = vpop.f32.mrf.mxu1  ;;  %v322_v18 = vpop.f32.mrf.mxu0 }
 0x12f   :  { %991 = vmatmul.msk.bf16.gmra.mxu1 %vm1355_vm14, %v1200_v35 }
 0x134   :  { %v349_v5 = vpop.f32.mrf.mxu1  ;;  %v324_v21 = vpop.f32.mrf.mxu0 }
 0x13c   :  { %v361_v7 = vpop.f32.mrf.mxu1  ;;  %v327_v26 = vpop.f32.mrf.mxu0 }
 0x13d   :  { %v362_v10 = vadd.f32 %v361_v7, %v312_v4 }
 0x144   :  { %v363_v9 = vpop.f32.mrf.mxu1  ;;  %v329_v28 = vpop.f32.mrf.mxu0 }
 0x145   :  { %v364_v11 = vadd.f32 %v363_v9, %v314_v6 }
 0x147   :  { %v417_v12 = vpack.c.bf16 %v364_v11, %v362_v10 }
 0x149   :  { %1008 = vmatmul.msk.bf16.vlgmr.msra.gmra.mxu2 %vm457_vm4, %v417_v12 }
 0x14c   :  { %v366_v14 = vpop.f32.mrf.mxu1 }
 0x14d   :  { %v367_v16 = vadd.f32 %v366_v14, %v317_v8  ;;  %v1448_v14 = vld [vmem:[%s1526_s2 + $0x8] sm:$0xff] }
 0x154   :  { %v368_v15 = vpop.f32.mrf.mxu1 }
 0x155   :  { %v369_v17 = vadd.f32 %v368_v15, %v319_v13  ;;  %v1442_v13 = vld [vmem:[%s1526_s2] sm:$0xff]  ;;  %v1454_v15 = vld [vmem:[%s1526_s2 + $0x10] sm:$0xff] }
 0x157   :  { %v418_v19 = vpack.c.bf16 %v369_v17, %v367_v16  ;;  %v1460_v16 = vld [vmem:[%s1526_s2 + $0x18] sm:$0xff]  ;;  %v1466_v17 = vld [vmem:[%s1526_s2 + $0x20] sm:$0xff] }
 0x159   :  { %1009 = vmatmul.msk.bf16.gmra.mxu2 %vm457_vm4, %v418_v19  ;;  %v1475_v19 = vld [vmem:[%s1526_s2 + $0x28] sm:$0xff] }
 0x15c   :  { %v371_v20 = vpop.f32.mrf.mxu1 }
 0x15d   :  { %v372_v23 = vadd.f32 %v371_v20, %v322_v18  ;;  %v1103_v18 = vld [vmem:[%s1529_s5 + $0x18] sm:$0xff]  ;;  %v1102_v20 = vld [vmem:[%s1529_s5 + $0x10] sm:$0xff] }
 0x15e   :  { %724 = vmatpush.bf16.msrb.mxu2 %v1103_v18 }
 0x162   :  { %725 = vmatpush.bf16.msrb.mxu2 %v1102_v20 }
 0x164   :  { %v373_v22 = vpop.f32.mrf.mxu1 }
 0x165   :  { %v374_v24 = vadd.f32 %v373_v22, %v324_v21  ;;  %v1484_v21 = vld [vmem:[%s1526_s2 + $0x30] sm:$0xff]  ;;  %v1490_v22 = vld [vmem:[%s1526_s2 + $0x38] sm:$0xff] }
 0x167   :  { %v419_v25 = vpack.c.bf16 %v374_v24, %v372_v23  ;;  %v1101_v23 = vld [vmem:[%s1529_s5 + $0x8] sm:$0xff]  ;;  %v1100_v24 = vld [vmem:[%s1529_s5] sm:$0xff]  ;;  %s1201_s5 = smov [#allocation2]  }
 0x168   :  { %726 = vmatpush.bf16.msrb.mxu2 %v1101_v23 }
 0x169   :  { %1010 = vmatmul.msk.bf16.gmra.mxu2 %vm457_vm4, %v419_v25 }
 0x16c   :  { %v376_v27 = vpop.f32.mrf.mxu1  ;;  %727 = vmatpush.bf16.msrb.mxu2 %v1100_v24 }
 0x16d   :  { %v377_v30 = vadd.f32 %v376_v27, %v327_v26  ;;  %v1171_v26 = vld [vmem:[%s1528_s4] ss:$0 sm:$0xff] }
 0x174   :  { %v378_v29 = vpop.f32.mrf.mxu1 }
 0x175   :  { %v379_v31 = vadd.f32 %v378_v29, %v329_v28 }
 0x177   :  { %v420_v32 = vpack.c.bf16 %v379_v31, %v377_v30 }
 0x179   :  { %1011 = vmatmul.msk.bf16.gmra.mxu2 %vm457_vm4, %v420_v32 }
 0x17c   :  { %v381_v33 = vpop.f32.mrf.mxu1 }
 0x17d   :  { %v382_v35 = vadd.f32 %v381_v33, %v332_v57 }
 0x184   :  { %v383_v34 = vpop.f32.mrf.mxu1 }
 0x185   :  { %v384_v36 = vadd.f32 %v383_v34, %v334_v58 }
 0x187   :  { %v421_v37 = vpack.c.bf16 %v384_v36, %v382_v35 }
 0x189   :  { %1012 = vmatmul.msk.bf16.gmra.mxu2 %vm457_vm4, %v421_v37 }
 0x18c   :  { %v386_v38 = vpop.f32.mrf.mxu1 }
 0x18d   :  { %v387_v40 = vadd.f32 %v386_v38, %v337_v59 }
 0x194   :  { %v388_v39 = vpop.f32.mrf.mxu1 }
 0x195   :  { %v389_v41 = vadd.f32 %v388_v39, %v339_v60 }
 0x197   :  { %v422_v42 = vpack.c.bf16 %v389_v41, %v387_v40 }
 0x199   :  { %1013 = vmatmul.msk.bf16.vlgmr.msra.gmra.mxu3 %vm457_vm4, %v422_v42 }
 0x19c   :  { %v391_v43 = vpop.f32.mrf.mxu1 }
 0x19d   :  { %v392_v45 = vadd.f32 %v391_v43, %v342_v62 }
 0x1a4   :  { %v393_v44 = vpop.f32.mrf.mxu1 }
 0x1a5   :  { %v394_v46 = vadd.f32 %v393_v44, %v344_v1 }
 0x1a7   :  { %v423_v47 = vpack.c.bf16 %v394_v46, %v392_v45 }
 0x1a9   :  { %1014 = vmatmul.msk.bf16.gmra.mxu3 %vm457_vm4, %v423_v47 }
 0x1ac   :  { %v396_v48 = vpop.f32.mrf.mxu1 }
 0x1ad   :  { %v397_v50 = vadd.f32 %v396_v48, %v347_v3 }
 0x1b4   :  { %v398_v49 = vpop.f32.mrf.mxu1 }
 0x1b5   :  { %v399_v51 = vadd.f32 %v398_v49, %v349_v5 }
 0x1b7   :  { %v424_v52 = vpack.c.bf16 %v399_v51, %v397_v50 }
 0x1b9   :  { %1015 = vmatmul.msk.bf16.gmra.mxu3 %vm457_vm4, %v424_v52 }
 0x1cc   :  { %v491_v53 = vpop.f32.mrf.mxu2 }
 0x1d4   :  { %v493_v54 = vpop.f32.mrf.mxu2 }
 0x1d5   :  { %v531_v12 = vpack.c.bf16 %v493_v54, %v491_v53 }
 0x1dc   :  { %v496_v55 = vpop.f32.mrf.mxu2 }
 0x1e4   :  { %v498_v56 = vpop.f32.mrf.mxu2 }
 0x1e5   :  { %v532_v11 = vpack.c.bf16 %v498_v56, %v496_v55 }
 0x1ec   :  { %v501_v57 = vpop.f32.mrf.mxu2 }
 0x1f4   :  { %v503_v60 = vpop.f32.mrf.mxu2 }
 0x1f5   :  { %v533_v10 = vpack.c.bf16 %v503_v60, %v501_v57 }
 0x1fc   :  { %v506_v62 = vpop.f32.mrf.mxu2 }
 0x204   :  { %v508_v0 = vpop.f32.mrf.mxu2 }
 0x205   :  { %v534_v9 = vpack.c.bf16 %v508_v0, %v506_v62 }
 0x20c   :  { %v511_v2 = vpop.f32.mrf.mxu2 }
 0x214   :  { %v513_v7 = vpop.f32.mrf.mxu2 }
 0x215   :  { %v535_v8 = vpack.c.bf16 %v513_v7, %v511_v2 }
 0x21c   :  { %v516_v58 = vpop.f32.mrf.mxu3 }
 0x224   :  { %v518_v59 = vpop.f32.mrf.mxu3 }
 0x225   :  { %v536_v6 = vpack.c.bf16 %v518_v59, %v516_v58 }
 0x22c   :  { %v521_v61 = vpop.f32.mrf.mxu3 }
 0x234   :  { %v523_v63 = vpop.f32.mrf.mxu3 }
 0x235   :  { %v537_v5 = vpack.c.bf16 %v523_v63, %v521_v61 }
 0x23c   :  { %v526_v1 = vpop.f32.mrf.mxu3 }
 0x244   :  { %v528_v4 = vpop.f32.mrf.mxu3 }
 0x245   :  { %v538_v3 = vpack.c.bf16 %v528_v4, %v526_v1 }
 0x247   :  { %591 = vmatpush.bf16.msrb.mxu3 %v538_v3 }
 0x24b   :  { %592 = vmatpush.bf16.msrb.mxu3 %v537_v5 }
 0x24f   :  { %593 = vmatpush.bf16.msrb.mxu3 %v536_v6 }
 0x253   :  { %594 = vmatpush.bf16.msrb.mxu3 %v535_v8 }
 0x257   :  { %595 = vmatpush.bf16.msrb.mxu3 %v534_v9 }
 0x25b   :  { %596 = vmatpush.bf16.msrb.mxu3 %v533_v10 }
 0x25f   :  { %597 = vmatpush.bf16.msrb.mxu3 %v532_v11 }
 0x263   :  { %598 = vmatpush.bf16.msrb.mxu3 %v531_v12 }
 0x266   :  { %599 = vmatmul.bf16.vlgmr.msrb.gmra.mxu3 %v1442_v13 }
 0x276   :  { %604 = vmatmul.bf16.gmra.mxu3 %v1448_v14 }
 0x286   :  { %609 = vmatmul.bf16.gmra.mxu3 %v1454_v15 }
 0x296   :  { %614 = vmatmul.bf16.gmra.mxu3 %v1460_v16 }
 0x2a6   :  { %619 = vmatmul.bf16.gmra.mxu3 %v1466_v17 }
 0x2b6   :  { %624 = vmatmul.bf16.gmra.mxu3 %v1475_v19 }
 0x2c6   :  { %629 = vmatmul.bf16.gmra.mxu3 %v1484_v21 }
 0x2d6   :  { %634 = vmatmul.bf16.gmra.mxu3 %v1490_v22 }
 0x2e9   :  { %v600_v25 = vpop.f32.mrf.mxu3 }
 0x2ea   :  { %v601_v27 = vadd.f32 %v1171_v26, %v600_v25 }
 0x2ec   :  { %v640_v30 = vmax.f32 %v601_v27, 0.0 }
 0x2f1   :  { %v602_v28 = vpop.f32.mrf.mxu3 }
 0x2f2   :  { %v603_v29 = vadd.f32 %v1171_v26, %v602_v28 }
 0x2f4   :  { %v641_v31 = vmax.f32 %v603_v29, 0.0 }
 0x2f6   :  { %v656_v32 = vpack.c.bf16 %v641_v31, %v640_v30 }
 0x2f8   :  { %1064 = vmatmul.msk.bf16.vlgmr.msrb.gmra.mxu2 %vm457_vm4, %v656_v32 }
 0x2f9   :  { %v605_v33 = vpop.f32.mrf.mxu3 }
 0x2fa   :  { %v606_v34 = vadd.f32 %v1171_v26, %v605_v33 }
 0x2fc   :  { %v642_v37 = vmax.f32 %v606_v34, 0.0 }
 0x301   :  { %v607_v35 = vpop.f32.mrf.mxu3 }
 0x302   :  { %v608_v36 = vadd.f32 %v1171_v26, %v607_v35 }
 0x304   :  { %v643_v38 = vmax.f32 %v608_v36, 0.0 }
 0x306   :  { %v657_v39 = vpack.c.bf16 %v643_v38, %v642_v37 }
 0x308   :  { %1065 = vmatmul.msk.bf16.gmra.mxu2 %vm457_vm4, %v657_v39 }
 0x309   :  { %v610_v40 = vpop.f32.mrf.mxu3 }
 0x30a   :  { %v611_v41 = vadd.f32 %v1171_v26, %v610_v40 }
 0x30c   :  { %v644_v44 = vmax.f32 %v611_v41, 0.0 }
 0x311   :  { %v612_v42 = vpop.f32.mrf.mxu3 }
 0x312   :  { %v613_v43 = vadd.f32 %v1171_v26, %v612_v42 }
 0x314   :  { %v645_v45 = vmax.f32 %v613_v43, 0.0 }
 0x316   :  { %v658_v46 = vpack.c.bf16 %v645_v45, %v644_v44 }
 0x318   :  { %1066 = vmatmul.msk.bf16.gmra.mxu2 %vm457_vm4, %v658_v46 }
 0x319   :  { %v615_v47 = vpop.f32.mrf.mxu3 }
 0x31a   :  { %v616_v48 = vadd.f32 %v1171_v26, %v615_v47 }
 0x31c   :  { %v646_v51 = vmax.f32 %v616_v48, 0.0 }
 0x321   :  { %v617_v49 = vpop.f32.mrf.mxu3 }
 0x322   :  { %v618_v50 = vadd.f32 %v1171_v26, %v617_v49 }
 0x324   :  { %v647_v52 = vmax.f32 %v618_v50, 0.0 }
 0x326   :  { %v659_v53 = vpack.c.bf16 %v647_v52, %v646_v51  ;;  %v1172_v51 = vld [vmem:[%s1530_s6] ss:$0 sm:$0xff]  ;;  %s882_s6 = sshll.u32 %s1201_s5, 4  ;;  %s883_s6 = int_to_ptr.vmem [resolvable:$true] %s882_s6 }
 0x328   :  { %1067 = vmatmul.msk.bf16.gmra.mxu2 %vm457_vm4, %v659_v53 }
 0x329   :  { %v620_v54 = vpop.f32.mrf.mxu3 }
 0x32a   :  { %v621_v55 = vadd.f32 %v1171_v26, %v620_v54 }
 0x32c   :  { %v648_v58 = vmax.f32 %v621_v55, 0.0 }
 0x331   :  { %v622_v56 = vpop.f32.mrf.mxu3 }
 0x332   :  { %v623_v57 = vadd.f32 %v1171_v26, %v622_v56 }
 0x334   :  { %v649_v59 = vmax.f32 %v623_v57, 0.0 }
 0x336   :  { %v660_v60 = vpack.c.bf16 %v649_v59, %v648_v58 }
 0x338   :  { %1068 = vmatmul.msk.bf16.gmra.mxu2 %vm457_vm4, %v660_v60 }
 0x339   :  { %v625_v61 = vpop.f32.mrf.mxu3 }
 0x33a   :  { %v626_v62 = vadd.f32 %v1171_v26, %v625_v61 }
 0x33c   :  { %v650_v1 = vmax.f32 %v626_v62, 0.0 }
 0x341   :  { %v627_v63 = vpop.f32.mrf.mxu3 }
 0x342   :  { %v628_v0 = vadd.f32 %v1171_v26, %v627_v63 }
 0x344   :  { %v651_v2 = vmax.f32 %v628_v0, 0.0 }
 0x346   :  { %v661_v4 = vpack.c.bf16 %v651_v2, %v650_v1 }
 0x348   :  { %1069 = vmatmul.msk.bf16.gmra.mxu2 %vm457_vm4, %v661_v4 }
 0x349   :  { %v630_v3 = vpop.f32.mrf.mxu3 }
 0x34a   :  { %v631_v5 = vadd.f32 %v1171_v26, %v630_v3 }
 0x34c   :  { %v652_v8 = vmax.f32 %v631_v5, 0.0 }
 0x351   :  { %v632_v6 = vpop.f32.mrf.mxu3 }
 0x352   :  { %v633_v7 = vadd.f32 %v1171_v26, %v632_v6 }
 0x354   :  { %v653_v9 = vmax.f32 %v633_v7, 0.0 }
 0x356   :  { %v662_v10 = vpack.c.bf16 %v653_v9, %v652_v8 }
 0x358   :  { %1070 = vmatmul.msk.bf16.gmra.mxu2 %vm457_vm4, %v662_v10 }
 0x359   :  { %v635_v11 = vpop.f32.mrf.mxu3 }
 0x35a   :  { %v636_v12 = vadd.f32 %v1171_v26, %v635_v11 }
 0x35c   :  { %v654_v23 = vmax.f32 %v636_v12, 0.0 }
 0x361   :  { %v637_v18 = vpop.f32.mrf.mxu3 }
 0x362   :  { %v638_v20 = vadd.f32 %v1171_v26, %v637_v18 }
 0x364   :  { %v655_v24 = vmax.f32 %v638_v20, 0.0 }
 0x366   :  { %v663_v25 = vpack.c.bf16 %v655_v24, %v654_v23 }
 0x368   :  { %1071 = vmatmul.msk.bf16.gmra.mxu2 %vm457_vm4, %v663_v25 }
 0x37b   :  { %v729_v27 = vpop.f32.mrf.mxu2 }
 0x383   :  { %v731_v28 = vpop.f32.mrf.mxu2 }
 0x384   :  { %v769_v29 = vpack.c.bf16 %v731_v28, %v729_v27 }
 0x38b   :  { %v734_v30 = vpop.f32.mrf.mxu2 }
 0x393   :  { %v736_v31 = vpop.f32.mrf.mxu2 }
 0x394   :  { %v770_v32 = vpack.c.bf16 %v736_v31, %v734_v30 }
 0x39b   :  { %v739_v33 = vpop.f32.mrf.mxu2 }
 0x3a3   :  { %v741_v34 = vpop.f32.mrf.mxu2 }
 0x3a4   :  { %v771_v35 = vpack.c.bf16 %v741_v34, %v739_v33 }
 0x3ab   :  { %v744_v36 = vpop.f32.mrf.mxu2 }
 0x3b3   :  { %v746_v37 = vpop.f32.mrf.mxu2 }
 0x3b4   :  { %v772_v38 = vpack.c.bf16 %v746_v37, %v744_v36 }
 0x3bb   :  { %v749_v39 = vpop.f32.mrf.mxu2 }
 0x3c3   :  { %v751_v40 = vpop.f32.mrf.mxu2 }
 0x3c4   :  { %v773_v49 = vpack.c.bf16 %v751_v40, %v749_v39 }
 0x3cb   :  { %v754_v26 = vpop.f32.mrf.mxu2 }
 0x3d3   :  { %v756_v41 = vpop.f32.mrf.mxu2 }
 0x3d4   :  { %v774_v48 = vpack.c.bf16 %v756_v41, %v754_v26 }
 0x3db   :  { %v759_v42 = vpop.f32.mrf.mxu2 }
 0x3e3   :  { %v761_v43 = vpop.f32.mrf.mxu2 }
 0x3e4   :  { %v775_v47 = vpack.c.bf16 %v761_v43, %v759_v42 }
 0x3eb   :  { %v764_v44 = vpop.f32.mrf.mxu2 }
 0x3f3   :  { %v766_v45 = vpop.f32.mrf.mxu2 }
 0x3f4   :  { %v776_v46 = vpack.c.bf16 %v766_v45, %v764_v44 }
 0x3f6   :  { %781 = vmatpush.bf16.msrb.mxu0 %v776_v46 }
 0x3fa   :  { %782 = vmatpush.bf16.msrb.mxu0 %v775_v47 }
 0x3fe   :  { %783 = vmatpush.bf16.msrb.mxu0 %v774_v48 }
 0x402   :  { %784 = vmatpush.bf16.msrb.mxu0 %v773_v49 }
 0x406   :  { %785 = vmatpush.bf16.msrb.mxu0 %v772_v38 }
 0x40a   :  { %786 = vmatpush.bf16.msrb.mxu0 %v771_v35 }
 0x40e   :  { %787 = vmatpush.bf16.msrb.mxu0 %v770_v32 }
 0x412   :  { %788 = vmatpush.bf16.msrb.mxu0 %v769_v29 }
 0x415   :  { %789 = vmatmul.bf16.vlgmr.msrb.gmra.mxu0 %v1442_v13 }
 0x425   :  { %794 = vmatmul.bf16.gmra.mxu0 %v1448_v14 }
 0x435   :  { %799 = vmatmul.bf16.gmra.mxu0 %v1454_v15 }
 0x445   :  { %804 = vmatmul.bf16.gmra.mxu0 %v1460_v16 }
 0x455   :  { %809 = vmatmul.bf16.gmra.mxu0 %v1466_v17 }
 0x465   :  { %814 = vmatmul.bf16.gmra.mxu0 %v1475_v19 }
 0x475   :  { %819 = vmatmul.bf16.gmra.mxu0 %v1484_v21 }
 0x485   :  { %824 = vmatmul.bf16.gmra.mxu0 %v1490_v22 }
 0x492   :  { %v790_v50 = vpop.f32.mrf.mxu0 }
 0x493   :  { %v791_v13 = vadd.f32 %v1172_v51, %v790_v50 }
 0x495   :  { %v830_v53 = vmax.f32 %v791_v13, 0.0 }
 0x49a   :  { %v792_v52 = vpop.f32.mrf.mxu0 }
 0x49b   :  { %v793_v14 = vadd.f32 %v1172_v51, %v792_v52 }
 0x49d   :  { %v831_v15 = vmax.f32 %v793_v14, 0.0 }
 0x49f   :  { %v1107_v54 = vpack.c.bf16 %v831_v15, %v830_v53 }
 0x4a1   :  { %1108 = vst [vmem:[#allocation2] sm:$0xff] %v1107_v54  }
 0x4a2   :  { %v795_v16 = vpop.f32.mrf.mxu0 }
 0x4a3   :  { %v796_v17 = vadd.f32 %v1172_v51, %v795_v16 }
 0x4a5   :  { %v832_v56 = vmax.f32 %v796_v17, 0.0 }
 0x4aa   :  { %v797_v55 = vpop.f32.mrf.mxu0 }
 0x4ab   :  { %v798_v19 = vadd.f32 %v1172_v51, %v797_v55 }
 0x4ad   :  { %v833_v21 = vmax.f32 %v798_v19, 0.0 }
 0x4af   :  { %v1112_v57 = vpack.c.bf16 %v833_v21, %v832_v56 }
 0x4b1   :  { %1144 = vst [vmem:[#allocation2 + $0x8] sm:$0xff] %v1112_v57  }
 0x4b2   :  { %v800_v22 = vpop.f32.mrf.mxu0 }
 0x4b3   :  { %v801_v58 = vadd.f32 %v1172_v51, %v800_v22 }
 0x4b5   :  { %v834_v61 = vmax.f32 %v801_v58, 0.0 }
 0x4ba   :  { %v802_v59 = vpop.f32.mrf.mxu0 }
 0x4bb   :  { %v803_v60 = vadd.f32 %v1172_v51, %v802_v59 }
 0x4bd   :  { %v835_v62 = vmax.f32 %v803_v60, 0.0 }
 0x4bf   :  { %v1117_v63 = vpack.c.bf16 %v835_v62, %v834_v61 }
 0x4c1   :  { %1145 = vst [vmem:[#allocation2 + $0x10] sm:$0xff] %v1117_v63  }
 0x4c2   :  { %v805_v0 = vpop.f32.mrf.mxu0 }
 0x4c3   :  { %v806_v1 = vadd.f32 %v1172_v51, %v805_v0 }
 0x4c5   :  { %v836_v3 = vmax.f32 %v806_v1, 0.0 }
 0x4ca   :  { %v807_v2 = vpop.f32.mrf.mxu0 }
 0x4cb   :  { %v808_v4 = vadd.f32 %v1172_v51, %v807_v2 }
 0x4cd   :  { %v837_v5 = vmax.f32 %v808_v4, 0.0 }
 0x4cf   :  { %v1122_v6 = vpack.c.bf16 %v837_v5, %v836_v3 }
 0x4d1   :  { %1146 = vst [vmem:[#allocation2 + $0x18] sm:$0xff] %v1122_v6  }
 0x4d2   :  { %v810_v7 = vpop.f32.mrf.mxu0 }
 0x4d3   :  { %v811_v8 = vadd.f32 %v1172_v51, %v810_v7 }
 0x4d5   :  { %v838_v11 = vmax.f32 %v811_v8, 0.0 }
 0x4da   :  { %v812_v9 = vpop.f32.mrf.mxu0 }
 0x4db   :  { %v813_v10 = vadd.f32 %v1172_v51, %v812_v9 }
 0x4dd   :  { %v839_v12 = vmax.f32 %v813_v10, 0.0 }
 0x4df   :  { %v1127_v18 = vpack.c.bf16 %v839_v12, %v838_v11 }
 0x4e1   :  { %1147 = vst [vmem:[#allocation2 + $0x20] sm:$0xff] %v1127_v18  }
 0x4e2   :  { %v815_v20 = vpop.f32.mrf.mxu0 }
 0x4e3   :  { %v816_v23 = vadd.f32 %v1172_v51, %v815_v20 }
 0x4e5   :  { %v840_v27 = vmax.f32 %v816_v23, 0.0 }
 0x4ea   :  { %v817_v24 = vpop.f32.mrf.mxu0 }
 0x4eb   :  { %v818_v25 = vadd.f32 %v1172_v51, %v817_v24 }
 0x4ed   :  { %v841_v28 = vmax.f32 %v818_v25, 0.0 }
 0x4ef   :  { %v1132_v29 = vpack.c.bf16 %v841_v28, %v840_v27 }
 0x4f1   :  { %1148 = vst [vmem:[#allocation2 + $0x28] sm:$0xff] %v1132_v29  }
 0x4f2   :  { %v820_v30 = vpop.f32.mrf.mxu0 }
 0x4f3   :  { %v821_v31 = vadd.f32 %v1172_v51, %v820_v30 }
 0x4f5   :  { %v842_v34 = vmax.f32 %v821_v31, 0.0 }
 0x4fa   :  { %v822_v32 = vpop.f32.mrf.mxu0 }
 0x4fb   :  { %v823_v33 = vadd.f32 %v1172_v51, %v822_v32 }
 0x4fd   :  { %v843_v35 = vmax.f32 %v823_v33, 0.0 }
 0x4ff   :  { %v1137_v36 = vpack.c.bf16 %v843_v35, %v842_v34 }
 0x501   :  { %1149 = vst [vmem:[#allocation2 + $0x30] sm:$0xff] %v1137_v36  }
 0x502   :  { %v825_v37 = vpop.f32.mrf.mxu0 }
 0x503   :  { %v826_v38 = vadd.f32 %v1172_v51, %v825_v37 }
 0x505   :  { %v844_v26 = vmax.f32 %v826_v38, 0.0 }
 0x50a   :  { %v827_v39 = vpop.f32.mrf.mxu0 }
 0x50b   :  { %v828_v40 = vadd.f32 %v1172_v51, %v827_v39 }
 0x50d   :  { %v845_v41 = vmax.f32 %v828_v40, 0.0 }
 0x50f   :  { %v1142_v42 = vpack.c.bf16 %v845_v41, %v844_v26 }
 0x511   :  { %1150 = vst [vmem:[#allocation2 + $0x38] sm:$0xff] %v1142_v42  }
 0x512   :  { %890 = dma.vmem_to_hbm [thread:$0]  %s883_s6, 1024, %s885_s0, [#allocation3], %s1202_s26, %s1202_s26, %s1203_s27  }
 0x513   :  { %1197 = dma.done.wait [#allocation3], 1024  }
 0x514   :  { %1198 = vsyncadd [#allocation3], 4294966272 }
 0x515   :  { %895 = vsyncpa [#allocation3], 1 }

</bundles_post_ra>
